<compile_context>
chip_gen: v7x
topology: tpu7x:2x2x1
jax: 0.10.0
libtpu: 0.0.40
codegen_flags: <defaults>
</compile_context>

<pallas_src>
import functools

import jax
import jax.numpy as jnp
from jax.experimental import pallas as pl
from jax.experimental.pallas import tpu as pltpu


REDUCER = "sum"  # 'sum' or 'mean' (module default is 'sum')


def _cdiv(a, b):
    return -(-a // b)


def _round_up(a, b):
    return _cdiv(a, b) * b


def _pool_kernel(aoff_ref, aend_ref, boff_ref, bend_ref,      # (B, 1) int32, VMEM
                 atom_ref, bond_ref, glob_ref,                 # (TN,D), (TN,D), (B,D)
                 out_ref,                                      # (B, 3*D)
                 atom_acc, bond_acc,                           # (B, D) f32 scratch
                 *, na_rows, nb_rows, reducer):
    """One row-tile of the fused atom/bond segment-sum pooling."""
    t = pl.program_id(0)
    nt = pl.num_programs(0)
    tn = atom_ref.shape[0]
    b_sz, d = atom_acc.shape
    base = t * tn

    @pl.when(t == 0)
    def _init():
        atom_acc[...] = jnp.zeros_like(atom_acc)
        bond_acc[...] = jnp.zeros_like(bond_acc)

    def tile_segment_sum(feat_ref, off, end, n_valid_rows, even_rows_only):
        # Global row id of every local row, broadcast over batch: (B, TN).
        row_b = base + jax.lax.broadcasted_iota(jnp.int32, (b_sz, tn), 1)
        sel = (row_b >= off) & (row_b < end)
        if even_rows_only:
            # feats['bond'][::2] folded into the selection matrix.
            sel = sel & (jnp.bitwise_and(row_b, 1) == 0)
        # Zero rows past the end of the array: edge-tile padding may hold garbage
        # (garbage * 0 via the matmul could still produce NaN, so clean the data).
        row_r = base + jax.lax.broadcasted_iota(jnp.int32, (tn, 1), 0)
        x = feat_ref[...]
        x = jnp.where(row_r < n_valid_rows, x, jnp.zeros_like(x))
        # Segment reduction as a one-hot matmul on the MXU.
        return jnp.dot(sel.astype(x.dtype), x, preferred_element_type=jnp.float32)

    atom_acc[...] += tile_segment_sum(
        atom_ref, aoff_ref[...], aend_ref[...], na_rows, False)
    bond_acc[...] += tile_segment_sum(
        bond_ref, boff_ref[...], bend_ref[...], nb_rows, True)

    @pl.when(t == nt - 1)
    def _finalize():
        a = atom_acc[...]
        b = bond_acc[...]
        if reducer == "mean":
            a_cnt = jnp.maximum(aend_ref[...] - aoff_ref[...], 1).astype(jnp.float32)
            b_cnt = jnp.maximum((bend_ref[...] - boff_ref[...]) // 2, 1).astype(jnp.float32)
            a = a * pl.reciprocal(a_cnt, approx=False)
            b = b * pl.reciprocal(b_cnt, approx=False)
        # Fused concat: write into the resident (B, 3*D) output block.
        out_ref[:, 0:d] = a.astype(out_ref.dtype)
        out_ref[:, d:2 * d] = b.astype(out_ref.dtype)
        out_ref[:, 2 * d:3 * d] = glob_ref[...].astype(out_ref.dtype)


def _fused_pooling_pallas(atom_feats, bond_feats_raw, global_feats,
                          atom_sizes, bond_sizes,
                          reducer=REDUCER, tile_rows=512):
    """Returns the fused (B, 3*D) = [atom_pool | bond_pool | global] tensor."""
    B, D = global_feats.shape
    Na = atom_feats.shape[0]
    Nb2 = bond_feats_raw.shape[0]   # raw, not [::2]-sliced

    atom_sizes = atom_sizes.astype(jnp.int32)
    bond_sizes = bond_sizes.astype(jnp.int32)

    # Segment boundaries (atoms in sliced coords, bonds in RAW row coords).
    a_end = jnp.cumsum(atom_sizes)
    a_off = a_end - atom_sizes
    b_end2 = 2 * jnp.cumsum(bond_sizes)
    b_off2 = b_end2 - 2 * bond_sizes

    def col(v):
        return v.reshape(B, 1).astype(jnp.int32)

    # Row-tile size: multiple of 8 sublanes, capped so VMEM stays bounded.
    tn = min(int(_round_up(max(tile_rows, 8), 8)),
             int(_round_up(max(Na, Nb2, 1), 8)))
    ta = max(_cdiv(Na, tn), 1)
    tb = max(_cdiv(Nb2, tn), 1)
    n_tiles = max(ta, tb)

    out_dtype = atom_feats.dtype

    kernel = functools.partial(_pool_kernel, na_rows=Na, nb_rows=Nb2,
                               reducer=reducer)

    grid_spec = pltpu.PrefetchScalarGridSpec(
        num_scalar_prefetch=0,
        grid=(n_tiles,),
        in_specs=[
            pl.BlockSpec((B, 1), lambda t: (0, 0)),   # atom offsets
            pl.BlockSpec((B, 1), lambda t: (0, 0)),   # atom ends
            pl.BlockSpec((B, 1), lambda t: (0, 0)),   # bond offsets (raw coords)
            pl.BlockSpec((B, 1), lambda t: (0, 0)),   # bond ends (raw coords)
            # Row-tiled feature arrays (block index clamped so the shorter array
            # never DMAs out of range; zero selection makes extra steps no-ops).
            pl.BlockSpec((tn, D), lambda t: (jnp.minimum(t, ta - 1), 0)),
            pl.BlockSpec((tn, D), lambda t: (jnp.minimum(t, tb - 1), 0)),
            pl.BlockSpec((B, D), lambda t: (0, 0)),   # global feats (tiny)
        ],
        out_specs=pl.BlockSpec((B, 3 * D), lambda t: (0, 0)),
        scratch_shapes=[
            pltpu.VMEM((B, D), jnp.float32),   # atom accumulator
            pltpu.VMEM((B, D), jnp.float32),   # bond accumulator
        ],
    )

    out = pl.pallas_call(
        kernel,
        grid_spec=grid_spec,
        out_shape=jax.ShapeDtypeStruct((B, 3 * D), out_dtype),
        compiler_params=pltpu.CompilerParams(
            dimension_semantics=("arbitrary",)),   # grid axis is a reduction
    )(col(a_off), col(a_end), col(b_off2), col(b_end2),
      atom_feats, bond_feats_raw, global_feats)
    return out


def base_pooling_forward(feats, metadata,
                         pool_atom_feats=True,
                         pool_bond_feats=True,
                         pool_global_feats=True,
                         reducer=REDUCER):
    """JAX/Pallas equivalent of BasePooling.forward.

    feats:    dict with 'atom' (Na, D), 'bond' (2*Nb, D), 'global' (B, D)
    metadata: dict with 'num_atoms' (len B), 'num_bonds' (len B)
    Returns:  (B, out_size) tensor.
    """
    atom_feats = feats["atom"]
    bond_feats_raw = feats["bond"]       # [::2] handled inside the kernel
    global_feats = feats["global"]
    atom_sizes = jnp.asarray(metadata["num_atoms"], jnp.int32)
    bond_sizes = jnp.asarray(metadata["num_bonds"], jnp.int32)

    D = global_feats.shape[-1]
    out = _fused_pooling_pallas(atom_feats, bond_feats_raw, global_feats,
                                atom_sizes, bond_sizes, reducer=reducer)

    if pool_atom_feats and pool_bond_feats and pool_global_feats:
        return out
    parts = []
    if pool_atom_feats:
        parts.append(out[:, 0:D])
    if pool_bond_feats:
        parts.append(out[:, D:2 * D])
    if pool_global_feats:
        parts.append(out[:, 2 * D:3 * D])
    return jnp.concatenate(parts, axis=-1)


def _reference_forward(feats, metadata, reducer=REDUCER):
    """Pure-JAX reference for correctness check."""
    atom_feats = feats["atom"]
    bond_feats = feats["bond"][::2]
    num_atoms = jnp.asarray(metadata["num_atoms"], jnp.int32)
    num_bonds = jnp.asarray(metadata["num_bonds"], jnp.int32)
    B = num_atoms.shape[0]

    atom_seg = jnp.repeat(jnp.arange(B), num_atoms,
                          total_repeat_length=atom_feats.shape[0])
    bond_seg = jnp.repeat(jnp.arange(B), num_bonds,
                          total_repeat_length=bond_feats.shape[0])
    atom_pooled = jax.ops.segment_sum(atom_feats, atom_seg, num_segments=B)
    bond_pooled = jax.ops.segment_sum(bond_feats, bond_seg, num_segments=B)
    if reducer == "mean":
        atom_pooled = atom_pooled / jnp.maximum(num_atoms, 1)[:, None]
        bond_pooled = bond_pooled / jnp.maximum(num_bonds, 1)[:, None]
    return jnp.concatenate([atom_pooled, bond_pooled, feats["global"]], axis=-1)


if __name__ == "__main__":
    key = jax.random.PRNGKey(0)
    k1, k2, k3 = jax.random.split(key, 3)

    B = 2                      # batch size (number of reactions)
    D = 32                     # in_size (atom/bond/global feature size)
    num_atoms = [5, 7]         # per-reaction atom counts
    num_bonds = [3, 5]         # per-reaction bond counts (after [::2])
    Na = sum(num_atoms)        # 12
    Nb2 = 2 * sum(num_bonds)   # 16 rows of bi-directed bond feats

    feats = {
        "atom": jax.random.normal(k1, (Na, D), jnp.float32),
        "bond": jax.random.normal(k2, (Nb2, D), jnp.float32),
        "global": jax.random.normal(k3, (B, D), jnp.float32),
    }
    metadata = {"num_atoms": num_atoms, "num_bonds": num_bonds}

    out = base_pooling_forward(feats, metadata)
    out = jax.block_until_ready(out)

    ref = _reference_forward(feats, metadata)
    assert out.shape == (B, 3 * D), out.shape
    assert jnp.allclose(out, ref, atol=1e-5, rtol=1e-5), \
        float(jnp.max(jnp.abs(out - ref)))

    print("KERNEL_OK")
</pallas_src>

<mosaic_0001>
module attributes {stable_mosaic.version = 11 : i64} {
  func.func @_pool_kernel(%arg0: i32, %arg1: memref<2x1xi32, #tpu.memory_space<vmem>>, %arg2: memref<2x1xi32, #tpu.memory_space<vmem>>, %arg3: memref<2x1xi32, #tpu.memory_space<vmem>>, %arg4: memref<2x1xi32, #tpu.memory_space<vmem>>, %arg5: memref<16x32xf32, #tpu.memory_space<vmem>>, %arg6: memref<16x32xf32, #tpu.memory_space<vmem>>, %arg7: memref<2x32xf32, #tpu.memory_space<vmem>>, %arg8: memref<2x96xf32, #tpu.memory_space<vmem>>, %arg9: memref<2x32xf32, #tpu.memory_space<vmem>>, %arg10: memref<2x32xf32, #tpu.memory_space<vmem>>) attributes {dimension_semantics = [#tpu.dimension_semantics<arbitrary>], iteration_bounds = array<i64: 1>, scalar_prefetch = 0 : i64, scratch_operands = 2 : i64, tpu.core_type = #tpu.core_type<tc>, window_params = [{pipeline_mode = #tpu.pipeline_mode<synchronous>, transform_indices = @transform_0, window_bounds = array<i64: 2, 1>}, {pipeline_mode = #tpu.pipeline_mode<synchronous>, transform_indices = @transform_1, window_bounds = array<i64: 2, 1>}, {pipeline_mode = #tpu.pipeline_mode<synchronous>, transform_indices = @transform_2, window_bounds = array<i64: 2, 1>}, {pipeline_mode = #tpu.pipeline_mode<synchronous>, transform_indices = @transform_3, window_bounds = array<i64: 2, 1>}, {transform_indices = @transform_4, window_bounds = array<i64: 16, 32>}, {transform_indices = @transform_5, window_bounds = array<i64: 16, 32>}, {pipeline_mode = #tpu.pipeline_mode<synchronous>, transform_indices = @transform_6, window_bounds = array<i64: 2, 32>}, {pipeline_mode = #tpu.pipeline_mode<synchronous>, transform_indices = @transform_7, window_bounds = array<i64: 2, 96>}]} {
    %c16_i32 = arith.constant 16 : i32
    %0 = arith.muli %arg0, %c16_i32 : i32
    %c0_i32 = arith.constant 0 : i32
    %1 = arith.cmpi eq, %arg0, %c0_i32 : i32
    %2 = arith.extui %1 : i1 to i32
    %c0_i32_0 = arith.constant 0 : i32
    %3 = arith.cmpi ne, %2, %c0_i32_0 : i32
    scf.if %3 {
      %cst_27 = arith.constant 0.000000e+00 : f32
      %64 = vector.broadcast %cst_27 : f32 to vector<2x32xf32>
      %c0_28 = arith.constant 0 : index
      %c0_29 = arith.constant 0 : index
      %65 = vector.load %arg9[%c0_28, %c0_29] : memref<2x32xf32, #tpu.memory_space<vmem>>, vector<2x32xf32>
      tpu.vector_store %arg9[%c0_28, %c0_29], %64 {strides = array<i32>} : memref<2x32xf32, #tpu.memory_space<vmem>>, vector<2x32xf32>,
      %cst_30 = arith.constant 0.000000e+00 : f32
      %66 = vector.broadcast %cst_30 : f32 to vector<2x32xf32>
      %c0_31 = arith.constant 0 : index
      %c0_32 = arith.constant 0 : index
      %67 = vector.load %arg10[%c0_31, %c0_32] : memref<2x32xf32, #tpu.memory_space<vmem>>, vector<2x32xf32>
      tpu.vector_store %arg10[%c0_31, %c0_32], %66 {strides = array<i32>} : memref<2x32xf32, #tpu.memory_space<vmem>>, vector<2x32xf32>,
    } else {
    }
    %c0 = arith.constant 0 : index
    %c0_1 = arith.constant 0 : index
    %4 = vector.load %arg9[%c0, %c0_1] : memref<2x32xf32, #tpu.memory_space<vmem>>, vector<2x32xf32>
    %c0_2 = arith.constant 0 : index
    %c0_3 = arith.constant 0 : index
    %5 = vector.load %arg1[%c0_2, %c0_3] : memref<2x1xi32, #tpu.memory_space<vmem>>, vector<2x1xi32>
    %c0_4 = arith.constant 0 : index
    %c0_5 = arith.constant 0 : index
    %6 = vector.load %arg2[%c0_4, %c0_5] : memref<2x1xi32, #tpu.memory_space<vmem>>, vector<2x1xi32>
    %7 = tpu.iota {dimensions = array<i32: 1>} : vector<2x16xi32>
    %8 = vector.broadcast %0 : i32 to vector<2x16xi32>
    %9 = arith.addi %8, %7 : vector<2x16xi32>
    %10 = vector.broadcast %5 : vector<2x1xi32> to vector<2x16xi32>
    %11 = arith.cmpi sge, %9, %10 : vector<2x16xi32>
    %12 = vector.broadcast %6 : vector<2x1xi32> to vector<2x16xi32>
    %13 = arith.cmpi slt, %9, %12 : vector<2x16xi32>
    %14 = arith.andi %11, %13 : vector<2x16xi1>
    %15 = tpu.iota {dimensions = array<i32: 0>} : vector<16x1xi32>
    %16 = vector.broadcast %0 : i32 to vector<16x1xi32>
    %17 = arith.addi %16, %15 : vector<16x1xi32>
    %c0_6 = arith.constant 0 : index
    %c0_7 = arith.constant 0 : index
    %18 = vector.load %arg5[%c0_6, %c0_7] : memref<16x32xf32, #tpu.memory_space<vmem>>, vector<16x32xf32>
    %c12_i32 = arith.constant 12 : i32
    %19 = vector.broadcast %c12_i32 : i32 to vector<16x1xi32>
    %20 = arith.cmpi slt, %17, %19 : vector<16x1xi32>
    %cst = arith.constant 0.000000e+00 : f32
    %21 = vector.broadcast %cst : f32 to vector<16x32xf32>
    %22 = vector.shape_cast %20 : vector<16x1xi1> to vector<16x1xi1>
    %23 = vector.broadcast %22 : vector<16x1xi1> to vector<16x32xi1>
    %24 = arith.select %23, %18, %21 : vector<16x32xi1>, vector<16x32xf32>
    %25 = arith.extui %14 : vector<2x16xi1> to vector<2x16xi32>
    %26 = arith.sitofp %25 : vector<2x16xi32> to vector<2x16xf32>
    %cst_8 = arith.constant dense<0.000000e+00> : vector<2x32xf32>
    %27 = tpu.matmul %26, %24, %cst_8 {dimension_numbers = #tpu.dot_dimension_numbers<[1], [0], [0], [1], [0, 0, 1, 1], [], []>} : vector<2x16xf32>, vector<16x32xf32>, vector<2x32xf32> -> vector<2x32xf32>
    %28 = arith.addf %4, %27 : vector<2x32xf32>
    %c0_9 = arith.constant 0 : index
    %c0_10 = arith.constant 0 : index
    %29 = vector.load %arg9[%c0_9, %c0_10] : memref<2x32xf32, #tpu.memory_space<vmem>>, vector<2x32xf32>
    tpu.vector_store %arg9[%c0_9, %c0_10], %28 {strides = array<i32>} : memref<2x32xf32, #tpu.memory_space<vmem>>, vector<2x32xf32>,
    %c0_11 = arith.constant 0 : index
    %c0_12 = arith.constant 0 : index
    %30 = vector.load %arg10[%c0_11, %c0_12] : memref<2x32xf32, #tpu.memory_space<vmem>>, vector<2x32xf32>
    %c0_13 = arith.constant 0 : index
    %c0_14 = arith.constant 0 : index
    %31 = vector.load %arg3[%c0_13, %c0_14] : memref<2x1xi32, #tpu.memory_space<vmem>>, vector<2x1xi32>
    %c0_15 = arith.constant 0 : index
    %c0_16 = arith.constant 0 : index
    %32 = vector.load %arg4[%c0_15, %c0_16] : memref<2x1xi32, #tpu.memory_space<vmem>>, vector<2x1xi32>
    %33 = tpu.iota {dimensions = array<i32: 1>} : vector<2x16xi32>
    %34 = vector.broadcast %0 : i32 to vector<2x16xi32>
    %35 = arith.addi %34, %33 : vector<2x16xi32>
    %36 = vector.broadcast %31 : vector<2x1xi32> to vector<2x16xi32>
    %37 = arith.cmpi sge, %35, %36 : vector<2x16xi32>
    %38 = vector.broadcast %32 : vector<2x1xi32> to vector<2x16xi32>
    %39 = arith.cmpi slt, %35, %38 : vector<2x16xi32>
    %40 = arith.andi %37, %39 : vector<2x16xi1>
    %c1_i32 = arith.constant 1 : i32
    %41 = vector.broadcast %c1_i32 : i32 to vector<2x16xi32>
    %42 = arith.andi %35, %41 : vector<2x16xi32>
    %c0_i32_17 = arith.constant 0 : i32
    %43 = vector.broadcast %c0_i32_17 : i32 to vector<2x16xi32>
    %44 = arith.cmpi eq, %42, %43 : vector<2x16xi32>
    %45 = arith.andi %40, %44 : vector<2x16xi1>
    %46 = tpu.iota {dimensions = array<i32: 0>} : vector<16x1xi32>
    %47 = vector.broadcast %0 : i32 to vector<16x1xi32>
    %48 = arith.addi %47, %46 : vector<16x1xi32>
    %c0_18 = arith.constant 0 : index
    %c0_19 = arith.constant 0 : index
    %49 = vector.load %arg6[%c0_18, %c0_19] : memref<16x32xf32, #tpu.memory_space<vmem>>, vector<16x32xf32>
    %c16_i32_20 = arith.constant 16 : i32
    %50 = vector.broadcast %c16_i32_20 : i32 to vector<16x1xi32>
    %51 = arith.cmpi slt, %48, %50 : vector<16x1xi32>
    %cst_21 = arith.constant 0.000000e+00 : f32
    %52 = vector.broadcast %cst_21 : f32 to vector<16x32xf32>
    %53 = vector.shape_cast %51 : vector<16x1xi1> to vector<16x1xi1>
    %54 = vector.broadcast %53 : vector<16x1xi1> to vector<16x32xi1>
    %55 = arith.select %54, %49, %52 : vector<16x32xi1>, vector<16x32xf32>
    %56 = arith.extui %45 : vector<2x16xi1> to vector<2x16xi32>
    %57 = arith.sitofp %56 : vector<2x16xi32> to vector<2x16xf32>
    %cst_22 = arith.constant dense<0.000000e+00> : vector<2x32xf32>
    %58 = tpu.matmul %57, %55, %cst_22 {dimension_numbers = #tpu.dot_dimension_numbers<[1], [0], [0], [1], [0, 0, 1, 1], [], []>} : vector<2x16xf32>, vector<16x32xf32>, vector<2x32xf32> -> vector<2x32xf32>
    %59 = arith.addf %30, %58 : vector<2x32xf32>
    %c0_23 = arith.constant 0 : index
    %c0_24 = arith.constant 0 : index
    %60 = vector.load %arg10[%c0_23, %c0_24] : memref<2x32xf32, #tpu.memory_space<vmem>>, vector<2x32xf32>
    tpu.vector_store %arg10[%c0_23, %c0_24], %59 {strides = array<i32>} : memref<2x32xf32, #tpu.memory_space<vmem>>, vector<2x32xf32>,
    %c0_i32_25 = arith.constant 0 : i32
    %61 = arith.cmpi eq, %arg0, %c0_i32_25 : i32
    %62 = arith.extui %61 : i1 to i32
    %c0_i32_26 = arith.constant 0 : i32
    %63 = arith.cmpi ne, %62, %c0_i32_26 : i32
    scf.if %63 {
      %c0_27 = arith.constant 0 : index
      %c0_28 = arith.constant 0 : index
      %64 = vector.load %arg9[%c0_27, %c0_28] : memref<2x32xf32, #tpu.memory_space<vmem>>, vector<2x32xf32>
      %c0_29 = arith.constant 0 : index
      %c0_30 = arith.constant 0 : index
      %65 = vector.load %arg10[%c0_29, %c0_30] : memref<2x32xf32, #tpu.memory_space<vmem>>, vector<2x32xf32>
      %c0_31 = arith.constant 0 : index
      %c0_32 = arith.constant 0 : index
      %66 = vector.load %arg8[%c0_31, %c0_32] : memref<2x96xf32, #tpu.memory_space<vmem>>, vector<2x32xf32>
      tpu.vector_store %arg8[%c0_31, %c0_32], %64 {strides = array<i32>} : memref<2x96xf32, #tpu.memory_space<vmem>>, vector<2x32xf32>,
      %c0_33 = arith.constant 0 : index
      %c32 = arith.constant 32 : index
      %67 = vector.load %arg8[%c0_33, %c32] : memref<2x96xf32, #tpu.memory_space<vmem>>, vector<2x32xf32>
      tpu.vector_store %arg8[%c0_33, %c32], %65 {strides = array<i32>} : memref<2x96xf32, #tpu.memory_space<vmem>>, vector<2x32xf32>,
      %c0_34 = arith.constant 0 : index
      %c0_35 = arith.constant 0 : index
      %68 = vector.load %arg7[%c0_34, %c0_35] : memref<2x32xf32, #tpu.memory_space<vmem>>, vector<2x32xf32>
      %c0_36 = arith.constant 0 : index
      %c64 = arith.constant 64 : index
      %69 = vector.load %arg8[%c0_36, %c64] : memref<2x96xf32, #tpu.memory_space<vmem>>, vector<2x32xf32>
      tpu.vector_store %arg8[%c0_36, %c64], %68 {strides = array<i32>} : memref<2x96xf32, #tpu.memory_space<vmem>>, vector<2x32xf32>,
    } else {
    }
    return
  }
  func.func @transform_0(%arg0: i32) -> (i32, i32) {
    %c0_i32 = arith.constant 0 : i32
    %c0_i32_0 = arith.constant 0 : i32
    %c0_i32_1 = arith.constant 0 : i32
    return %c0_i32, %c0_i32_0 : i32, i32
  }
  func.func @transform_1(%arg0: i32) -> (i32, i32) {
    %c0_i32 = arith.constant 0 : i32
    %c0_i32_0 = arith.constant 0 : i32
    %c0_i32_1 = arith.constant 0 : i32
    return %c0_i32, %c0_i32_0 : i32, i32
  }
  func.func @transform_2(%arg0: i32) -> (i32, i32) {
    %c0_i32 = arith.constant 0 : i32
    %c0_i32_0 = arith.constant 0 : i32
    %c0_i32_1 = arith.constant 0 : i32
    return %c0_i32, %c0_i32_0 : i32, i32
  }
  func.func @transform_3(%arg0: i32) -> (i32, i32) {
    %c0_i32 = arith.constant 0 : i32
    %c0_i32_0 = arith.constant 0 : i32
    %c0_i32_1 = arith.constant 0 : i32
    return %c0_i32, %c0_i32_0 : i32, i32
  }
  func.func @transform_4(%arg0: i32) -> (i32, i32) {
    %c0_i32 = arith.constant 0 : i32
    %0 = arith.minsi %arg0, %c0_i32 : i32
    %c0_i32_0 = arith.constant 0 : i32
    %c0_i32_1 = arith.constant 0 : i32
    return %0, %c0_i32_0 : i32, i32
  }
  func.func @transform_5(%arg0: i32) -> (i32, i32) {
    %c0_i32 = arith.constant 0 : i32
    %0 = arith.minsi %arg0, %c0_i32 : i32
    %c0_i32_0 = arith.constant 0 : i32
    %c0_i32_1 = arith.constant 0 : i32
    return %0, %c0_i32_0 : i32, i32
  }
  func.func @transform_6(%arg0: i32) -> (i32, i32) {
    %c0_i32 = arith.constant 0 : i32
    %c0_i32_0 = arith.constant 0 : i32
    %c0_i32_1 = arith.constant 0 : i32
    return %c0_i32, %c0_i32_0 : i32, i32
  }
  func.func @transform_7(%arg0: i32) -> (i32, i32) {
    %c0_i32 = arith.constant 0 : i32
    %c0_i32_0 = arith.constant 0 : i32
    %c0_i32_1 = arith.constant 0 : i32
    return %c0_i32, %c0_i32_0 : i32, i32
  }
}

</mosaic_0001>

<bundles_post_ra>
// kernel: tpu_custom_call.1
= control target key start
LH: loop header
LB: loop body
LE: loop exit
PB: predicated region body
PF: predicated region fallthrough
CT: control target
= control target key end

     0   :  { %v346_v1 = vmov 0   ;;  %s438_s0 = inlined_call_operand.vmem [shape: s32[2,1], index: 0, kind: input, shape index: {}]   ;;  %s439_s1 = inlined_call_operand.vmem [shape: s32[2,1], index: 1, kind: input, shape index: {}]   ;;  %s440_s2 = inlined_call_operand.vmem [shape: s32[2,1], index: 2, kind: input, shape index: {}]   ;;  %s441_s3 = inlined_call_operand.vmem [shape: s32[2,1], index: 3, kind: input, shape index: {}]   ;;  %s442_s4 = inlined_call_operand.vmem [shape: f32[12,32], index: 4, kind: input, shape index: {}]   ;;  %s443_s5 = inlined_call_operand.vmem [shape: f32[16,32], index: 5, kind: input, shape index: {}]   ;;  %s444_s6 = inlined_call_operand.vmem [shape: f32[2,32], index: 6, kind: input, shape index: {}]   ;;  %s445_s7 = inlined_call_operand.hbm [shape: f32[2,96], index: 7, kind: output, shape index: {}]  }
   0x1   :  { %v146_v0 = vld [vmem:[%s440_s2] sm:$0x3]  ;;  %320 = vset.pattern.permute.xlu0 %v346_v1  ;;  %321 = vset.pattern.permute.xlu1 %v346_v1 }
   0x2   :  { %v36_v2 = vld [vmem:[%s438_s0] sm:$0x3] }
   0x3   :  { %12 = vsyncpa [#allocation5], 0  ;;  %149 = vperm.xlu0 %320, %v146_v0   ;;  %43 = vperm.xlu1 %321, %v36_v2   ;;  %v147_v3 = vld [vmem:[%s441_s3] sm:$0x3]  ;;  %v161_v6 = vld [vmem:[%s443_s5 + $0x8] sm:$0xff]  ;;  %v347_v8 = vmov 0.0|0.0   ;;  %v38_v9 = vlaneseq }
   0x4   :  { %v37_v4 = vld [vmem:[%s439_s1] sm:$0x3]  ;;  %309 = vmatprep.subr.bf16.mxu1 %v347_v8  ;;  %305 = vmatprep.subr.bf16.mxu0 %v347_v8  ;;  %vm348_vm0 = vmmov 0   ;;  %v349_v10 = vmov 0.0   ;;  %v57_v13 = vld [vmem:[%s442_s4 + $0x8] sm:$0xff]  ;;  %vm32_vm1 = vcmask 254976  }
   0x5   :  { %v160_v5 = vld [vmem:[%s443_s5] sm:$0xff]  ;;  %302 = vmatprep.mubr.msk.f32.mxu1 %vm348_vm0, %v349_v10  ;;  %295 = vmatprep.mubr.msk.f32.mxu0 %vm348_vm0, %v349_v10  ;;  %v52_v11 = vshrl.u32 %v38_v9, 7  ;;  %34 = vst.msk [vmem:[#allocation3] sm:$0x3] %vm32_vm1, %v349_v10  ;;  %33 = vst.msk [vmem:[#allocation2] sm:$0x3] %vm32_vm1, %v349_v10 }
   0x6   :  { %v310_v7 = vpack.c.bf16 %v161_v6, %v160_v5  ;;  %v56_v12 = vld [vmem:[%s442_s4] sm:$0xff]  ;;  %vm350_vm3 = vmmov 1   ;;  %v39_v16 = vand.u32 127, %v38_v9  ;;  %vm68_vm11 = vcmask 130048   ;;  %s351_s13 = smov 64   ;;  %s352_s14 = smov 32  }
   0x7   :  { %153 = vperm.xlu0 %320, %v147_v3   ;;  %47 = vperm.xlu1 %321, %v37_v4   ;;  %v53_v14 = vadd.s32 8, %v52_v11  ;;  %v306_v15 = vpack.c.bf16 %v57_v13, %v56_v12  ;;  %v259_v24 = vld [vmem:[%s444_s6] sm:$0x3]  ;;  %s353_s6 = smov [#allocation4]   ;;  %vm257_vm14 = vcmask 517376   ;;  %vm264_vm15 = vcmask 779776  }
   0x8   :  { %311 = vmatpush3.bf16.msra.mxu1 %v310_v7  ;;  %v157_v18 = vand.u32 1, %v39_v16  ;;  %s272_s15 = sshll.u32 %s353_s6, 4  ;;  %s273_s15 = int_to_ptr.vmem [resolvable:$true] %s272_s15 }
   0x9   :  { %vm59_vm2 = vcmp.lt.s32.totalorder %v53_v14, 12  ;;  %s322_s16 = scalar_lea.vmem %s273_s15, 32  ;;  %p327_p1 = scmp.lt.s32.totalorder %s273_s15, %s273_s15 }
   0xa   :  { %vm307_vm4 = vmpackc.low %vm59_vm2, %vm350_vm3  ;;  %vm158_vm5 = vcmp.eq.s32.totalorder %v157_v18, 0  ;;  %p323_p0 = scmp.ne.s32.totalorder %s273_s15, %s322_s16  ;;  %p328_p2 = scmp.lt.s32.totalorder %s322_s16, %s322_s16 }
   0xb   :  { %308 = vmatpush3.bf16.msk.msra.mxu0 %vm307_vm4, %v306_v15  ;;  %261 = vrot.lane.b32.xlu1 %v259_v24, %s351_s13 }
   0xc   :  { %v145_v25 = vld [vmem:[#allocation3] sm:$0x3]  ;;  %v35_v26 = vld [vmem:[#allocation2] sm:$0x3]  ;;  %p329_p3 = por %p328_p2, %p327_p1 }
   0xe   :  { %p330_p4 = pnand %p329_p3, %p323_p0 }
  0x82   :  { %v150_v17 = vpop.permute.xlu0 %149  ;;  %v44_v19 = vpop.permute.xlu1 %43 }
  0x83   :  { %vm151_vm6 = vcmp.ge.s32.totalorder %v39_v16, %v150_v17  ;;  %vm45_vm8 = vcmp.ge.s32.totalorder %v39_v16, %v44_v19 }
  0x86   :  { %v154_v20 = vpop.permute.xlu0 %153  ;;  %v48_v21 = vpop.permute.xlu1 %47 }
  0x87   :  { %vm155_vm7 = vcmp.lt.s32.totalorder %v39_v16, %v154_v20  ;;  %vm49_vm9 = vcmp.lt.s32.totalorder %v39_v16, %v48_v21 }
  0x88   :  { %vm156_vm10 = vmand %vm151_vm6, %vm155_vm7 }
  0x89   :  { %vm159_vm12 = vmand %vm156_vm10, %vm158_vm5 }
  0x8a   :  { %v283_v22 = vsel %vm159_vm12, 1.0, %v349_v10  ;;  %vm50_vm13 = vmand %vm45_vm8, %vm49_vm9  ;;  %v262_v35 = vpop.permute.xlu1 %261 }
  0x8b   :  { %303 = vmatmul.mubr.msk.f32.vlgmr.msra.gmra.mrb[0].mxu1 %vm68_vm11, %v283_v22  ;;  %v280_v23 = vsel %vm50_vm13, 1.0, %v349_v10 }
  0x8c   :  { %296 = vmatmul.mubr.msk.f32.vlgmr.msra.gmra.mrb[0].mxu0 %vm68_vm11, %v280_v23 }
 0x15e   :  { %v241_v27 = vpop.f32.mrb[0].mxu1 }
 0x15f   :  { %v245_v28 = vadd.f32 %v241_v27, %v145_v25  ;;  %v304_v29 = vpop.f32.mrb[1].mxu1  ;;  %v138_v30 = vpop.f32.mrb[0].mxu0 }
 0x160   :  { %v142_v31 = vadd.f32 %v138_v30, %v35_v26  ;;  %v297_v32 = vpop.f32.mrb[1].mxu0 }
 0x161   :  { %246 = vst.msk [vmem:[#allocation3] sm:$0x3] %vm32_vm1, %v245_v28 }
 0x162   :  { %144 = vst.msk [vmem:[#allocation2] sm:$0x3] %vm32_vm1, %v142_v31 }
 0x168   :  { %v251_v33 = vld [vmem:[#allocation3] sm:$0x3] }
 0x169   :  { %254 = vrot.lane.b32.xlu0 %v251_v33, %s352_s14  ;;  %v250_v34 = vld [vmem:[#allocation2] sm:$0x3] }
 0x16a   :  { %252 = vst.msk [vmem:[#allocation4] sm:$0x3] %vm32_vm1, %v250_v34 }
 0x1db   :  { %v255_v36 = vpop.permute.xlu0 %254 }
 0x1dc   :  { %258 = vst.msk [vmem:[#allocation4] sm:$0x3] %vm257_vm14, %v255_v36 }
 0x1dd   :  { %265 = vst.msk [vmem:[#allocation4] sm:$0x3] %vm264_vm15, %v262_v35 }
 0x1de   :  { %333 = shalt.err (!%p330_p4)
}
 0x1df   :  { %s334_s19 = scalar_lea.hbm %s445_s7, 32 }
 0x1e0   :  { %p335_p5 = scmp.ne.s32.totalorder %s445_s7, %s334_s19  ;;  %p338_p6 = scmp.lt.u32.totalorder %s334_s19, %s445_s7 }
 0x1e2   :  { %p340_p7 = pnand %p338_p6, %p335_p5 }
 0x1e4   :  { %343 = shalt.err (!%p340_p7)
}
 0x1e5   :  { %275 = dma.vmem_to_hbm [thread:$0]  %s273_s15, 32, %s445_s7, [#allocation5]  }
 0x1e6   :  { %344 = dma.done.wait [#allocation5], 32  }
 0x1e7   :  { %345 = vsyncadd [#allocation5], 4294967264 }
 0x1e8   :  { %279 = vsyncpa [#allocation5], 1 }

</bundles_post_ra>
